<compile_context>
chip_gen: v7x
topology: tpu7x:2x2x1
jax: 0.10.0
libtpu: 0.0.40
codegen_flags: <defaults>
</compile_context>

<pallas_src>
import functools

import jax
import jax.numpy as jnp
from jax import lax
from jax.experimental import pallas as pl
from jax.experimental.pallas import tpu as pltpu


def _hn_nce_kernel(v_ref, t_ref, loss_ref,
                   rs_ref, cs1_ref, ce2_ref, dlane_ref, v2t_ref,
                   *, temperature, alpha, beta, batch, block_rows, num_phases):
    p = pl.program_id(0)       # phase: (num_phases-1) == weighted-sum pass
    r = pl.program_id(1)       # row-block index
    nb = pl.num_programs(1)
    last_phase = num_phases - 1

    inv_temp = 1.0 / temperature

    @pl.when(jnp.logical_and(p == 0, r == 0))
    def _init():
        ce2_ref[...] = jnp.zeros_like(ce2_ref)
        dlane_ref[...] = jnp.zeros_like(dlane_ref)
        v2t_ref[...] = jnp.zeros_like(v2t_ref)
        if num_phases == 1:
            # beta == 0: E1 == 1 everywhere, so denomA = denomB = B - 1 and the
            # statistics pass is not needed at all.
            rs_ref[...] = jnp.full(rs_ref.shape, batch - 1.0, rs_ref.dtype)
            cs1_ref[...] = jnp.full(cs1_ref.shape, float(batch), cs1_ref.dtype)
        else:
            cs1_ref[...] = jnp.zeros_like(cs1_ref)

    # (bm, B) strip of the similarity matrix: matmul in the input dtype on the
    # MXU (NT contraction, no transpose), f32 accumulate, scaled by 1/temp.
    sim = lax.dot_general(v_ref[...], t_ref[...],
                          (((1,), (1,)), ((), ())),
                          preferred_element_type=jnp.float32) * inv_temp
    bm = sim.shape[0]

    row = lax.broadcasted_iota(jnp.int32, sim.shape, 0) + r * block_rows
    col = lax.broadcasted_iota(jnp.int32, sim.shape, 1)
    diag_masked = jnp.where(row == col, sim, 0.0)
    d_row = jnp.sum(diag_masked, axis=1, keepdims=True)          # (bm, 1)

    row_start = pl.multiple_of(r * block_rows, block_rows)

    if num_phases == 2:
        @pl.when(p == 0)
        def _stats_pass():
            e1 = jnp.exp(beta * sim)                              # (bm, B)
            # denomA for the rows of this block (row sum of E1 minus diagonal).
            rs = jnp.sum(e1, axis=1, keepdims=True) - jnp.exp(beta * d_row)
            rs_ref[pl.ds(row_start, bm), :] = rs
            # Full column sums of E1 (diag removed once, in the finalize step).
            cs1_ref[...] += jnp.sum(e1, axis=0, keepdims=True)

    @pl.when(p == last_phase)
    def _weighted_pass():
        # Lane-major copy of diag(sim): non-block lanes contribute zero.
        dlane_ref[...] += jnp.sum(diag_masked, axis=0, keepdims=True)

        e2 = jnp.exp((1.0 + beta) * sim)                          # (bm, B)
        ce2_ref[...] += jnp.sum(e2, axis=0, keepdims=True)

        inv_rs = 1.0 / rs_ref[...]                                # (B, 1)
        # sum_j E2[i, j] / denomA[j]  — matvec on the (otherwise idle) MXU.
        rw = lax.dot_general(e2, inv_rs, (((1,), (0,)), ((), ())),
                             preferred_element_type=jnp.float32)  # (bm, 1)
        e2d = jnp.exp((1.0 + beta) * d_row)                       # (bm, 1)
        diag_term = e2d * (1.0 / rs_ref[pl.ds(row_start, bm), :])
        s_v2t = alpha * jnp.exp(d_row) + (batch - 1.0) * (rw - diag_term)
        den_v2t = jnp.log(s_v2t)
        v2t_ref[...] += jnp.sum(den_v2t - d_row, axis=0, keepdims=True)

    @pl.when(jnp.logical_and(p == last_phase, r == nb - 1))
    def _finalize():
        d_lane = dlane_ref[...]                                   # (1, B)
        denom_b = cs1_ref[...] - jnp.exp(beta * d_lane)
        num = ce2_ref[...] - jnp.exp((1.0 + beta) * d_lane)
        s_t2v = alpha * jnp.exp(d_lane) + (batch - 1.0) * num / denom_b
        den_t2v = jnp.log(s_t2v)
        t2v_sum = jnp.sum(den_t2v - d_lane, axis=1, keepdims=True)
        loss_ref[...] = (v2t_ref[...] + t2v_sum) * (1.0 / batch)


def hard_negative_nce(video_embds, text_embds, *, temperature=0.07,
                      alpha=1.0, beta=0.0, block_rows=None):
    """Pallas HN-NCE loss. video_embds, text_embds: (batch, dim)."""
    b, d = video_embds.shape
    assert text_embds.shape == (b, d)
    assert b >= 2

    if block_rows is None:
        # 256-aligned tiles keep the v6e/v7x MXU full and are 128-multiples
        # for v5e; otherwise fall back to a single row block.
        for cand in (256, 128):
            if b % cand == 0:
                block_rows = cand
                break
        else:
            block_rows = b
    assert b % block_rows == 0
    # Keep row-block starts sublane-aligned (avoids masked dynamic stores).
    assert block_rows == b or block_rows % 8 == 0
    nb = b // block_rows

    # beta == 0 (Info-NCE default): single pass; otherwise two passes.
    num_phases = 1 if float(beta) == 0.0 else 2

    kernel = functools.partial(
        _hn_nce_kernel, temperature=float(temperature), alpha=float(alpha),
        beta=float(beta), batch=b, block_rows=block_rows, num_phases=num_phases)

    out = pl.pallas_call(
        kernel,
        out_shape=jax.ShapeDtypeStruct((1, 1), jnp.float32),
        grid_spec=pltpu.PrefetchScalarGridSpec(
            num_scalar_prefetch=0,
            grid=(num_phases, nb),
            in_specs=[
                pl.BlockSpec((block_rows, d), lambda p, r: (r, 0)),
                pl.BlockSpec((b, d), lambda p, r: (0, 0)),   # T stays resident
            ],
            out_specs=pl.BlockSpec((1, 1), lambda p, r: (0, 0)),
            scratch_shapes=[
                pltpu.VMEM((b, 1), jnp.float32),   # denomA (row sums of E1 - diag)
                pltpu.VMEM((1, b), jnp.float32),   # column sums of E1
                pltpu.VMEM((1, b), jnp.float32),   # column sums of E2
                pltpu.VMEM((1, b), jnp.float32),   # diag(sim), lane-major
                pltpu.VMEM((1, 1), jnp.float32),   # running sum of (den_v2t - d)
            ]),
        compiler_params=pltpu.CompilerParams(
            # Both axes carry cross-step accumulation -> sequential.
            dimension_semantics=("arbitrary", "arbitrary"),
            vmem_limit_bytes=48 * 1024 * 1024),
    )(video_embds, text_embds)
    return out[0, 0]


def _reference_hn_nce(video, text, *, temperature, alpha, beta):
    """Pure-JAX reference mirroring the PyTorch forward (labels=None) literally."""
    b = video.shape[0]
    sim = lax.dot_general(video, text, (((1,), (1,)), ((), ())),
                          preferred_element_type=jnp.float32) * (1.0 / temperature)
    d = jnp.diagonal(sim)
    eb = jnp.exp(beta * sim)
    denom_a = eb.sum(axis=1) - jnp.exp(beta * d)   # (B,)
    denom_b = eb.sum(axis=0) - jnp.exp(beta * d)   # (B,)
    # NOTE: torch's `(B,B) / (B,)` broadcasts the 1-D denominator over the LAST
    # axis (columns); reproduce that literally for both directions.
    w_v2t = (b - 1) * eb / denom_a[None, :]
    w_t2v = (b - 1) * eb / denom_b[None, :]
    eye = jnp.eye(b, dtype=bool)
    w_v2t = jnp.where(eye, alpha, w_v2t)
    w_t2v = jnp.where(eye, alpha, w_t2v)
    es = jnp.exp(sim)
    den_v2t = jnp.log((es * w_v2t).sum(axis=1))
    den_t2v = jnp.log((es * w_t2v).sum(axis=0))
    return (den_v2t - d).mean() + (den_t2v - d).mean()


if __name__ == "__main__":
    key = jax.random.PRNGKey(0)
    kv, kt = jax.random.split(key)
    batch, dim = 16, 32
    video = jax.random.normal(kv, (batch, dim), dtype=jnp.float32)
    text = jax.random.normal(kt, (batch, dim), dtype=jnp.float32)
    # L2-normalize like typical contrastive embeddings (keeps exp() tame).
    video = video / jnp.linalg.norm(video, axis=-1, keepdims=True)
    text = text / jnp.linalg.norm(text, axis=-1, keepdims=True)

    cases = [
        dict(temperature=0.07, alpha=1.0, beta=0.0),   # Info-NCE: single-pass path
        dict(temperature=0.07, alpha=1.0, beta=0.5),   # hard-negative: two-pass path
    ]
    for cfg in cases:
        # block_rows=8 -> 2 row blocks: exercises the tiled accumulation path.
        loss = hard_negative_nce(video, text, block_rows=8, **cfg)
        jax.block_until_ready(loss)
        ref = _reference_hn_nce(video, text, **cfg)
        assert jnp.allclose(loss, ref, rtol=1e-4, atol=1e-4), (cfg, loss, ref)

    # Default (auto) tile selection: single row block.
    loss_auto = hard_negative_nce(video, text, **cases[1])
    jax.block_until_ready(loss_auto)
    ref_auto = _reference_hn_nce(video, text, **cases[1])
    assert jnp.allclose(loss_auto, ref_auto, rtol=1e-4, atol=1e-4), (loss_auto, ref_auto)

    # bf16 inputs: matmul stays bf16 on the MXU (f32 accumulate), mirroring the
    # PyTorch module's model-dtype matmul followed by .float().
    video_bf = video.astype(jnp.bfloat16)
    text_bf = text.astype(jnp.bfloat16)
    loss_bf = hard_negative_nce(video_bf, text_bf, block_rows=8,
                                temperature=0.07, alpha=1.0, beta=0.5)
    jax.block_until_ready(loss_bf)
    ref_bf = _reference_hn_nce(video_bf, text_bf,
                               temperature=0.07, alpha=1.0, beta=0.5)
    assert jnp.allclose(loss_bf, ref_bf, rtol=5e-2, atol=5e-2), (loss_bf, ref_bf)

    print("KERNEL_OK")
</pallas_src>

<mosaic_0001>
module attributes {stable_mosaic.version = 11 : i64} {
  func.func @_hn_nce_kernel(%arg0: i32, %arg1: i32, %arg2: memref<8x32xf32, #tpu.memory_space<vmem>>, %arg3: memref<16x32xf32, #tpu.memory_space<vmem>>, %arg4: memref<1x1xf32, #tpu.memory_space<vmem>>, %arg5: memref<16x1xf32, #tpu.memory_space<vmem>>, %arg6: memref<1x16xf32, #tpu.memory_space<vmem>>, %arg7: memref<1x16xf32, #tpu.memory_space<vmem>>, %arg8: memref<1x16xf32, #tpu.memory_space<vmem>>, %arg9: memref<1x1xf32, #tpu.memory_space<vmem>>) attributes {dimension_semantics = [#tpu.dimension_semantics<arbitrary>, #tpu.dimension_semantics<arbitrary>], iteration_bounds = array<i64: 1, 2>, scalar_prefetch = 0 : i64, scratch_operands = 5 : i64, tpu.core_type = #tpu.core_type<tc>, window_params = [{transform_indices = @transform_0, window_bounds = array<i64: 8, 32>}, {pipeline_mode = #tpu.pipeline_mode<synchronous>, transform_indices = @transform_1, window_bounds = array<i64: 16, 32>}, {pipeline_mode = #tpu.pipeline_mode<synchronous>, transform_indices = @transform_2, window_bounds = array<i64: 1, 1>}]} {
    %c0_i32 = arith.constant 0 : i32
    %0 = arith.cmpi eq, %arg0, %c0_i32 : i32
    %c0_i32_0 = arith.constant 0 : i32
    %1 = arith.cmpi eq, %arg1, %c0_i32_0 : i32
    %2 = arith.andi %0, %1 : i1
    %3 = arith.extui %2 : i1 to i32
    %c0_i32_1 = arith.constant 0 : i32
    %4 = arith.cmpi ne, %3, %c0_i32_1 : i32
    scf.if %4 {
      %cst_13 = arith.constant 0.000000e+00 : f32
      %30 = vector.broadcast %cst_13 : f32 to vector<1x16xf32>
      %c0_14 = arith.constant 0 : index
      %c0_15 = arith.constant 0 : index
      %31 = vector.load %arg7[%c0_14, %c0_15] : memref<1x16xf32, #tpu.memory_space<vmem>>, vector<1x16xf32>
      tpu.vector_store %arg7[%c0_14, %c0_15], %30 {strides = array<i32>} : memref<1x16xf32, #tpu.memory_space<vmem>>, vector<1x16xf32>,
      %cst_16 = arith.constant 0.000000e+00 : f32
      %32 = vector.broadcast %cst_16 : f32 to vector<1x16xf32>
      %c0_17 = arith.constant 0 : index
      %c0_18 = arith.constant 0 : index
      %33 = vector.load %arg8[%c0_17, %c0_18] : memref<1x16xf32, #tpu.memory_space<vmem>>, vector<1x16xf32>
      tpu.vector_store %arg8[%c0_17, %c0_18], %32 {strides = array<i32>} : memref<1x16xf32, #tpu.memory_space<vmem>>, vector<1x16xf32>,
      %cst_19 = arith.constant 0.000000e+00 : f32
      %34 = vector.broadcast %cst_19 : f32 to vector<1x1xf32>
      %c0_20 = arith.constant 0 : index
      %c0_21 = arith.constant 0 : index
      %35 = vector.load %arg9[%c0_20, %c0_21] : memref<1x1xf32, #tpu.memory_space<vmem>>, vector<1x1xf32>
      tpu.vector_store %arg9[%c0_20, %c0_21], %34 {strides = array<i32>} : memref<1x1xf32, #tpu.memory_space<vmem>>, vector<1x1xf32>,
      %cst_22 = arith.constant 1.500000e+01 : f32
      %36 = vector.broadcast %cst_22 : f32 to vector<16x1xf32>
      %c0_23 = arith.constant 0 : index
      %c0_24 = arith.constant 0 : index
      %37 = vector.load %arg5[%c0_23, %c0_24] : memref<16x1xf32, #tpu.memory_space<vmem>>, vector<16x1xf32>
      tpu.vector_store %arg5[%c0_23, %c0_24], %36 {strides = array<i32>} : memref<16x1xf32, #tpu.memory_space<vmem>>, vector<16x1xf32>,
      %cst_25 = arith.constant 1.600000e+01 : f32
      %38 = vector.broadcast %cst_25 : f32 to vector<1x16xf32>
      %c0_26 = arith.constant 0 : index
      %c0_27 = arith.constant 0 : index
      %39 = vector.load %arg6[%c0_26, %c0_27] : memref<1x16xf32, #tpu.memory_space<vmem>>, vector<1x16xf32>
      tpu.vector_store %arg6[%c0_26, %c0_27], %38 {strides = array<i32>} : memref<1x16xf32, #tpu.memory_space<vmem>>, vector<1x16xf32>,
    } else {
    }
    %c0 = arith.constant 0 : index
    %c0_2 = arith.constant 0 : index
    %5 = vector.load %arg2[%c0, %c0_2] : memref<8x32xf32, #tpu.memory_space<vmem>>, vector<8x32xf32>
    %c0_3 = arith.constant 0 : index
    %c0_4 = arith.constant 0 : index
    %6 = vector.load %arg3[%c0_3, %c0_4] : memref<16x32xf32, #tpu.memory_space<vmem>>, vector<16x32xf32>
    %cst = arith.constant dense<0.000000e+00> : vector<8x16xf32>
    %7 = tpu.matmul %5, %6, %cst {dimension_numbers = #tpu.dot_dimension_numbers<[1], [1], [0], [0], [0, 0, 1, 0], [], []>} : vector<8x32xf32>, vector<16x32xf32>, vector<8x16xf32> -> vector<8x16xf32>
    %cst_5 = arith.constant 14.2857141 : f32
    %8 = vector.broadcast %cst_5 : f32 to vector<8x16xf32>
    %9 = arith.mulf %7, %8 : vector<8x16xf32>
    %10 = tpu.iota {dimensions = array<i32: 0>} : vector<8x16xi32>
    %c8_i32 = arith.constant 8 : i32
    %11 = arith.muli %arg1, %c8_i32 : i32
    %12 = vector.broadcast %11 : i32 to vector<8x16xi32>
    %13 = arith.addi %10, %12 : vector<8x16xi32>
    %14 = tpu.iota {dimensions = array<i32: 1>} : vector<8x16xi32>
    %15 = arith.cmpi eq, %13, %14 : vector<8x16xi32>
    %cst_6 = arith.constant 0.000000e+00 : f32
    %16 = vector.broadcast %cst_6 : f32 to vector<8x16xf32>
    %17 = arith.select %15, %9, %16 : vector<8x16xi1>, vector<8x16xf32>
    %cst_7 = arith.constant dense<0.000000e+00> : vector<8xf32>
    %18 = vector.multi_reduction <add>, %17, %cst_7 [1] : vector<8x16xf32> to vector<8xf32>
    %19 = vector.shape_cast %18 : vector<8xf32> to vector<8x1xf32>
    %c8_i32_8 = arith.constant 8 : i32
    %20 = arith.muli %arg1, %c8_i32_8 : i32
    %21 = tpu.assume_multiple %20, 8 : i32
    %c0_i32_9 = arith.constant 0 : i32
    %22 = arith.cmpi eq, %arg0, %c0_i32_9 : i32
    %23 = arith.extui %22 : i1 to i32
    %c0_i32_10 = arith.constant 0 : i32
    %24 = arith.cmpi ne, %23, %c0_i32_10 : i32
    scf.if %24 {
      %c0_13 = arith.constant 0 : index
      %c0_14 = arith.constant 0 : index
      %30 = vector.load %arg8[%c0_13, %c0_14] : memref<1x16xf32, #tpu.memory_space<vmem>>, vector<1x16xf32>
      %cst_15 = arith.constant dense<0.000000e+00> : vector<16xf32>
      %31 = vector.multi_reduction <add>, %17, %cst_15 [0] : vector<8x16xf32> to vector<16xf32>
      %32 = vector.shape_cast %31 : vector<16xf32> to vector<1x16xf32>
      %33 = arith.addf %30, %32 : vector<1x16xf32>
      %c0_16 = arith.constant 0 : index
      %c0_17 = arith.constant 0 : index
      %34 = vector.load %arg8[%c0_16, %c0_17] : memref<1x16xf32, #tpu.memory_space<vmem>>, vector<1x16xf32>
      tpu.vector_store %arg8[%c0_16, %c0_17], %33 {strides = array<i32>} : memref<1x16xf32, #tpu.memory_space<vmem>>, vector<1x16xf32>,
      %cst_18 = arith.constant 1.000000e+00 : f32
      %35 = vector.broadcast %cst_18 : f32 to vector<8x16xf32>
      %36 = arith.mulf %35, %9 : vector<8x16xf32>
      %37 = math.exp %36 : vector<8x16xf32>
      %c0_19 = arith.constant 0 : index
      %c0_20 = arith.constant 0 : index
      %38 = vector.load %arg7[%c0_19, %c0_20] : memref<1x16xf32, #tpu.memory_space<vmem>>, vector<1x16xf32>
      %cst_21 = arith.constant dense<0.000000e+00> : vector<16xf32>
      %39 = vector.multi_reduction <add>, %37, %cst_21 [0] : vector<8x16xf32> to vector<16xf32>
      %40 = vector.shape_cast %39 : vector<16xf32> to vector<1x16xf32>
      %41 = arith.addf %38, %40 : vector<1x16xf32>
      %c0_22 = arith.constant 0 : index
      %c0_23 = arith.constant 0 : index
      %42 = vector.load %arg7[%c0_22, %c0_23] : memref<1x16xf32, #tpu.memory_space<vmem>>, vector<1x16xf32>
      tpu.vector_store %arg7[%c0_22, %c0_23], %41 {strides = array<i32>} : memref<1x16xf32, #tpu.memory_space<vmem>>, vector<1x16xf32>,
      %c0_24 = arith.constant 0 : index
      %c0_25 = arith.constant 0 : index
      %43 = vector.load %arg5[%c0_24, %c0_25] : memref<16x1xf32, #tpu.memory_space<vmem>>, vector<16x1xf32>
      %cst_26 = arith.constant 1.000000e+00 : f32
      %44 = vector.broadcast %cst_26 : f32 to vector<16x1xf32>
      %45 = arith.divf %44, %43 : vector<16x1xf32>
      %cst_27 = arith.constant dense<0.000000e+00> : vector<8x1xf32>
      %46 = tpu.matmul %37, %45, %cst_27 {dimension_numbers = #tpu.dot_dimension_numbers<[1], [0], [0], [1], [0, 0, 1, 1], [], []>} : vector<8x16xf32>, vector<16x1xf32>, vector<8x1xf32> -> vector<8x1xf32>
      %cst_28 = arith.constant 1.000000e+00 : f32
      %47 = vector.broadcast %cst_28 : f32 to vector<8x1xf32>
      %48 = arith.mulf %47, %19 : vector<8x1xf32>
      %49 = math.exp %48 : vector<8x1xf32>
      %50 = arith.index_cast %21 : i32 to index
      %c0_29 = arith.constant 0 : index
      %51 = vector.load %arg5[%50, %c0_29] : memref<16x1xf32, #tpu.memory_space<vmem>>, vector<8x1xf32>
      %cst_30 = arith.constant 1.000000e+00 : f32
      %52 = vector.broadcast %cst_30 : f32 to vector<8x1xf32>
      %53 = arith.divf %52, %51 : vector<8x1xf32>
      %54 = arith.mulf %49, %53 : vector<8x1xf32>
      %55 = math.exp %19 : vector<8x1xf32>
      %cst_31 = arith.constant 1.000000e+00 : f32
      %56 = vector.broadcast %cst_31 : f32 to vector<8x1xf32>
      %57 = arith.mulf %56, %55 : vector<8x1xf32>
      %58 = arith.subf %46, %54 : vector<8x1xf32>
      %cst_32 = arith.constant 1.500000e+01 : f32
      %59 = vector.broadcast %cst_32 : f32 to vector<8x1xf32>
      %60 = arith.mulf %59, %58 : vector<8x1xf32>
      %61 = arith.addf %57, %60 : vector<8x1xf32>
      %62 = math.log %61 : vector<8x1xf32>
      %c0_33 = arith.constant 0 : index
      %c0_34 = arith.constant 0 : index
      %63 = vector.load %arg9[%c0_33, %c0_34] : memref<1x1xf32, #tpu.memory_space<vmem>>, vector<1x1xf32>
      %64 = arith.subf %62, %19 : vector<8x1xf32>
      %cst_35 = arith.constant dense<0.000000e+00> : vector<1xf32>
      %65 = vector.multi_reduction <add>, %64, %cst_35 [0] : vector<8x1xf32> to vector<1xf32>
      %66 = vector.shape_cast %65 : vector<1xf32> to vector<1x1xf32>
      %67 = arith.addf %63, %66 : vector<1x1xf32>
      %c0_36 = arith.constant 0 : index
      %c0_37 = arith.constant 0 : index
      %68 = vector.load %arg9[%c0_36, %c0_37] : memref<1x1xf32, #tpu.memory_space<vmem>>, vector<1x1xf32>
      tpu.vector_store %arg9[%c0_36, %c0_37], %67 {strides = array<i32>} : memref<1x1xf32, #tpu.memory_space<vmem>>, vector<1x1xf32>,
    } else {
    }
    %c0_i32_11 = arith.constant 0 : i32
    %25 = arith.cmpi eq, %arg0, %c0_i32_11 : i32
    %c1_i32 = arith.constant 1 : i32
    %26 = arith.cmpi eq, %arg1, %c1_i32 : i32
    %27 = arith.andi %25, %26 : i1
    %28 = arith.extui %27 : i1 to i32
    %c0_i32_12 = arith.constant 0 : i32
    %29 = arith.cmpi ne, %28, %c0_i32_12 : i32
    scf.if %29 {
      %c0_13 = arith.constant 0 : index
      %c0_14 = arith.constant 0 : index
      %30 = vector.load %arg8[%c0_13, %c0_14] : memref<1x16xf32, #tpu.memory_space<vmem>>, vector<1x16xf32>
      %c0_15 = arith.constant 0 : index
      %c0_16 = arith.constant 0 : index
      %31 = vector.load %arg6[%c0_15, %c0_16] : memref<1x16xf32, #tpu.memory_space<vmem>>, vector<1x16xf32>
      %cst_17 = arith.constant 0.000000e+00 : f32
      %32 = vector.broadcast %cst_17 : f32 to vector<1x16xf32>
      %33 = arith.mulf %32, %30 : vector<1x16xf32>
      %34 = math.exp %33 : vector<1x16xf32>
      %35 = arith.subf %31, %34 : vector<1x16xf32>
      %c0_18 = arith.constant 0 : index
      %c0_19 = arith.constant 0 : index
      %36 = vector.load %arg7[%c0_18, %c0_19] : memref<1x16xf32, #tpu.memory_space<vmem>>, vector<1x16xf32>
      %cst_20 = arith.constant 1.000000e+00 : f32
      %37 = vector.broadcast %cst_20 : f32 to vector<1x16xf32>
      %38 = arith.mulf %37, %30 : vector<1x16xf32>
      %39 = math.exp %38 : vector<1x16xf32>
      %40 = arith.subf %36, %39 : vector<1x16xf32>
      %41 = math.exp %30 : vector<1x16xf32>
      %cst_21 = arith.constant 1.000000e+00 : f32
      %42 = vector.broadcast %cst_21 : f32 to vector<1x16xf32>
      %43 = arith.mulf %42, %41 : vector<1x16xf32>
      %cst_22 = arith.constant 1.500000e+01 : f32
      %44 = vector.broadcast %cst_22 : f32 to vector<1x16xf32>
      %45 = arith.mulf %44, %40 : vector<1x16xf32>
      %46 = arith.divf %45, %35 : vector<1x16xf32>
      %47 = arith.addf %43, %46 : vector<1x16xf32>
      %48 = math.log %47 : vector<1x16xf32>
      %49 = arith.subf %48, %30 : vector<1x16xf32>
      %cst_23 = arith.constant dense<0.000000e+00> : vector<1xf32>
      %50 = vector.multi_reduction <add>, %49, %cst_23 [1] : vector<1x16xf32> to vector<1xf32>
      %51 = vector.shape_cast %50 : vector<1xf32> to vector<1x1xf32>
      %c0_24 = arith.constant 0 : index
      %c0_25 = arith.constant 0 : index
      %52 = vector.load %arg9[%c0_24, %c0_25] : memref<1x1xf32, #tpu.memory_space<vmem>>, vector<1x1xf32>
      %53 = arith.addf %52, %51 : vector<1x1xf32>
      %cst_26 = arith.constant 6.250000e-02 : f32
      %54 = vector.broadcast %cst_26 : f32 to vector<1x1xf32>
      %55 = arith.mulf %53, %54 : vector<1x1xf32>
      %c0_27 = arith.constant 0 : index
      %c0_28 = arith.constant 0 : index
      %56 = vector.load %arg4[%c0_27, %c0_28] : memref<1x1xf32, #tpu.memory_space<vmem>>, vector<1x1xf32>
      tpu.vector_store %arg4[%c0_27, %c0_28], %55 {strides = array<i32>} : memref<1x1xf32, #tpu.memory_space<vmem>>, vector<1x1xf32>,
    } else {
    }
    return
  }
  func.func @transform_0(%arg0: i32, %arg1: i32) -> (i32, i32) {
    %c0_i32 = arith.constant 0 : i32
    %c0_i32_0 = arith.constant 0 : i32
    return %arg1, %c0_i32 : i32, i32
  }
  func.func @transform_1(%arg0: i32, %arg1: i32) -> (i32, i32) {
    %c0_i32 = arith.constant 0 : i32
    %c0_i32_0 = arith.constant 0 : i32
    %c0_i32_1 = arith.constant 0 : i32
    return %c0_i32, %c0_i32_0 : i32, i32
  }
  func.func @transform_2(%arg0: i32, %arg1: i32) -> (i32, i32) {
    %c0_i32 = arith.constant 0 : i32
    %c0_i32_0 = arith.constant 0 : i32
    %c0_i32_1 = arith.constant 0 : i32
    return %c0_i32, %c0_i32_0 : i32, i32
  }
}

</mosaic_0001>

<bundles_post_ra>
// kernel: tpu_custom_call.1
= control target key start
LH: loop header
LB: loop body
LE: loop exit
PB: predicated region body
PF: predicated region fallthrough
CT: control target
= control target key end

     0   :  { %7 = vsyncpa [#allocation8], 0  ;;  %s1046_s0 = inlined_call_operand.hbm [shape: f32[16,32], index: 0, kind: input, shape index: {}]   ;;  %s1047_s1 = inlined_call_operand.hbm [shape: f32[16,32], index: 1, kind: input, shape index: {}]   ;;  %s1048_s2 = inlined_call_operand.hbm [shape: f32[1,1], index: 2, kind: output, shape index: {}]  }
   0x1   :  { %9 = vsyncpa [#allocation8 + $0x1], 0 }
   0x2   :  { %10 = vsyncpa [#allocation11], 0 }
   0x3   :  { %11 = vsyncpa [#allocation9], 0  ;;  %s844_s9 = smov 0   ;;  %s846_s10 = smov 0  }
   0x4   :  { %s848_s11 = smov 0   ;;  %s850_s12 = smov 0  }
   0x5   :  { %s852_s13 = smov 0   ;;  %s854_s14 = smov 0  }
   0x6 LB: > { %s524_s15 = sadd.s32 4294967295, %s816_s14   ;;  %p49_p0 = scmp.ne.s32.totalorder %s800_s10, %s796_s9  ;;  %s816_s14 = sphi %s854_s14, %s17_s14   ;;  %s812_s13 = sphi %s852_s13, %s1066_s13   ;;  %s808_s12 = sphi %s850_s12, %s1065_s12   ;;  %s804_s11 = sphi %s848_s11, %s1064_s11   ;;  %s800_s10 = sphi %s846_s10, %s1063_s10   ;;  %s796_s9 = sphi %s844_s9, %s1062_s9  }
   0x7   : > { %p876_p1 = scmp.eq.s32.totalorder %s524_s15, 0  ;;  %p525_p2 = scmp.ge.s32.totalorder %s816_s14, 1 }
   0x8   : > { %p102_p3 = scmp.lt.s32.totalorder %s816_s14, 3  ;;  %s818_s19 = smov [#allocation10]  }
   0x9   : > { %s1053_s16 = scalar_select %p876_p1, 1, 0 }
   0xa   : > { %p884_p4 = por %p876_p1, %p49_p0  ;;  %p888_p5 = pnand %p525_p2, %p102_p3 }
   0xb   : > { %s114_s20 = sshll.u32 %s818_s19, 4  ;;  %s26_s22 = sadd.s32 1, %s812_s13  ;;  %s115_s20 = int_to_ptr.vmem [resolvable:$true] %s114_s20 }
   0xc   : > { %s1054_s17 = scalar_select %p884_p4, 1, 0 }
   0xd   : > { %s1055_s18 = scalar_select %p888_p5, 1, 0 }
   0xe   : > { %p583_p6 = pneg %p888_p5  ;;  %s674_s25 = scalar_lea.hbm %s1047_s1, 256 }
   0xf   : > { %p675_p8 = scmp.ne.s32.totalorder %s1047_s1, %s674_s25  ;;  %p681_p12 = scmp.lt.u32.totalorder %s674_s25, %s1047_s1 }
  0x10   : > { %p896_p7 = pnand %p583_p6, %p876_p1 }
  0x12   : > { %p676_p9 = pneg %p896_p7 }
  0x14   : > { %p677_p10 = pnand %p676_p9, %p675_p8 }
  0x16   : > { %p678_p11 = pneg %p677_p10 }
  0x18   : > { %p683_p13 = pnand %p681_p12, %p678_p11 }
  0x1a   : > { %686 = shalt.err (!%p683_p13)
}
  0x1b   : > { %s687_s30 = scalar_lea.vmem %s115_s20, 256  ;;  %p695_p6 = scmp.lt.s32.totalorder %s115_s20, %s115_s20 }
  0x1c   : > { %p688_p0 = scmp.ne.s32.totalorder %s115_s20, %s687_s30  ;;  %p696_p1 = scmp.lt.s32.totalorder %s687_s30, %s687_s30 }
  0x1e   : > { %p690_p2 = pnand %p688_p0, %p676_p9  ;;  %p697_p4 = por %p696_p1, %p695_p6 }
  0x20   : > { %p691_p3 = pneg %p690_p2 }
  0x22   : > { %p698_p5 = pnand %p697_p4, %p691_p3 }
  0x24   : > { %701 = shalt.err (!%p698_p5)
}
  0x25   : > { %s819_s3 = smov 128   ;;  %s820_s4 = smov 8  }
  0x26   : > { %586 = dma.hbm_to_vmem [thread:$0]  (!%p896_p7), %s1047_s1, 256, %s115_s20, [#allocation11], %s819_s3, %s819_s3, %s820_s4  }
  0x27   : > { %p27_p1 = scmp.ge.s32.totalorder %s26_s22, 2  ;;  %s36_s7 = sadd.s32 1, %s804_s11 }
  0x28   : > { %p43_p4 = scmp.ne.s32.totalorder %s804_s11, %s800_s10  ;;  %p44_p5 = scmp.eq.s32.totalorder %s816_s14, 0 }
  0x29   : > { %s1068_s22 = smov (%p27_p1, %s26_s22), 0  ;;  %p592_p9 = scmp.lt.s32.totalorder %s816_s14, 2 }
  0x2a   : > { %p45_p8 = por %p44_p5, %p43_p4  ;;  %s33_s8 = ssub.s32 %s812_s13, %s1068_s22 }
  0x2b   : > { %s128_s9 = sand.u32 1, %s804_s11   ;;  %p34_p10 = scmp.eq.s32.totalorder %s33_s8, 0 }
  0x2c   : > { %s528_s19 = sshll.u32 %s128_s9, 3  ;;  %s529_s23 = sshll.u32 %s812_s13, 7 }
  0x2d   : > { %s929_s24 = scalar_select %p34_p10, %s804_s11, %s36_s7  }
  0x2e   : > { %s934_s20 = scalar_lea.hbm %s1046_s0, %s529_s23  ;;  %s132_s26 = scalar_lea.vmem [#allocation7], %s528_s19 }
  0x2f   : > { %s139_s27 = sshll.u32 %s132_s26, 4  ;;  %p936_p7 = pnand %p592_p9, %p45_p8  ;;  %s940_s27 = int_to_ptr.vmem [resolvable:$true] %s139_s27 }
  0x30   : > { %s129_s29 = scalar_lea.sflag [#allocation8], %s128_s9  ;;  %s702_s30 = scalar_lea.hbm %s934_s20, 128 }
  0x31   : > { %p703_p11 = scmp.ne.s32.totalorder %s934_s20, %s702_s30  ;;  %p704_p12 = pneg %p936_p7 }
  0x32   : > { %s707_s5 = scalar_lea.hbm %s1046_s0, 256  ;;  %p708_p2 = scmp.lt.u32.totalorder %s934_s20, %s1046_s0 }
  0x33   : > { %p705_p13 = pnand %p704_p12, %p703_p11  ;;  %p709_p3 = scmp.lt.u32.totalorder %s707_s5, %s702_s30 }
  0x34   : > { %p711_p1 = scmp.lt.u32.totalorder %s702_s30, %s934_s20 }
  0x35   : > { %p706_p0 = pneg %p705_p13  ;;  %p710_p6 = por %p709_p3, %p708_p2 }
  0x37   : > { %p712_p4 = por %p711_p1, %p710_p6 }
  0x39   : > { %p713_p5 = pnand %p712_p4, %p706_p0 }
  0x3b   : > { %716 = shalt.err (!%p713_p5)
}
  0x3c   : > { %s717_s8 = scalar_lea.vmem %s940_s27, 128  ;;  %s821_s9 = smov [#allocation7]  }
  0x3d   : > { %p718_p8 = scmp.ne.s32.totalorder %s940_s27, %s717_s8  ;;  %s722_s19 = sshll.u32 %s821_s9, 4  ;;  %s723_s19 = int_to_ptr.vmem [resolvable:$false] %s722_s19 }
  0x3e   : > { %s724_s23 = scalar_lea.vmem %s723_s19, 256  ;;  %p725_p11 = scmp.lt.s32.totalorder %s940_s27, %s723_s19 }
  0x3f   : > { %p720_p9 = pnand %p718_p8, %p704_p12  ;;  %p726_p13 = scmp.lt.s32.totalorder %s724_s23, %s717_s8 }
  0x41   : > { %p721_p10 = pneg %p720_p9  ;;  %p727_p2 = por %p726_p13, %p725_p11 }
  0x43   : > { %p728_p3 = pnand %p727_p2, %p721_p10 }
  0x45   : > { %731 = shalt.err (!%p728_p3)
}
  0x46   : > { %590 = dma.hbm_to_vmem [thread:$0]  (!%p936_p7), %s934_s20, 128, %s940_s27, %s129_s29  }
  0x47   : > { %p1058_p0 = scmp.ne.s32.totalorder %s1055_s18, 0 }
  0x48   : > { %s150_s21 = sand.u32 (!%p1058_p0), 1, %s800_s10   ;;  %p1059_p12 = scmp.ne.s32.totalorder (!%p1058_p0), %s1054_s17, 0 }
  0x49   : > { %148 = sbr.rel (%p1058_p0) target bundleno = 765 (0x2fd), region = 28  ;;  %s970_s25 = sshll.u32 (!%p1058_p0), %s150_s21, 3 }
  0x4a   : > { %s151_s26 = scalar_lea.sflag (!%p1058_p0), [#allocation8], %s150_s21  ;;  %s154_s30 = scalar_lea.vmem (!%p1058_p0), [#allocation7], %s970_s25 }
  0x50   : > { %783 = dma.done.wait (%p1059_p12), %s151_s26, 128  }
  0x51   : > { %785 = vsyncadd (%p1059_p12), %s151_s26, 4294967168  ;;  %p1060_p6 = scmp.ne.s32.totalorder %s1053_s16, 0 }
  0x53   : > { %787 = dma.done.wait (%p1060_p6), [#allocation11], 256  }
  0x54   : > { %789 = vsyncadd (%p1060_p6), [#allocation11], 4294967040  ;;  %p175_p7 = scmp.eq.s32.totalorder %s808_s12, 0 }
  0x55   : > { %vm180_vm0 = vcmask (%p175_p7), 122880   ;;  %vm183_vm1 = vcmask (%p175_p7), 0   ;;  %vm185_vm2 = vcmask (%p175_p7), 7168   ;;  %v822_v0 = vmov (%p175_p7), 0.0  }
  0x56   : > { %179 = sbr.rel (!%p175_p7) target bundleno = 93 (0x5d), region = 40  ;;  %181 = vst.msk [vmem:[#allocation4] sm:$0x1] (%p175_p7), %vm180_vm0, %v822_v0  ;;  %182 = vst.msk [vmem:[#allocation5] sm:$0x1] (%p175_p7), %vm180_vm0, %v822_v0  ;;  %v823_v1 = vmov (%p175_p7), 15.0  }
  0x57   : > { %184 = vst.msk [vmem:[#allocation6] sm:$0x1] (%p175_p7), %vm183_vm1, %v822_v0  ;;  %v824_v2 = vmov (%p175_p7), 16.0  }
  0x58   : > { %186 = vst.msk [vmem:[#allocation2] sm:$0xff] (%p175_p7), %vm185_vm2, %v823_v1  ;;  %187 = vst.msk [vmem:[#allocation2 + $0x8] sm:$0xff] (%p175_p7), %vm185_vm2, %v823_v1 }
  0x59   : > { %188 = vst.msk [vmem:[#allocation3] sm:$0x1] (%p175_p7), %vm180_vm0, %v824_v2 }
  0x5d PF: > { %v190_v3 = vld [vmem:[#allocation10] sm:$0xff]  ;;  %v191_v4 = vld [vmem:[#allocation10 + $0x8] sm:$0xff]  ;;  %vm192_vm3 = vcmask 261120   ;;  %v825_v5 = vmov 0.0|0.0   ;;  %vm826_vm5 = vmmov 0   ;;  %v827_v7 = vmov 0.0  }
  0x5e   : > { %566 = vmatprep.subr.bf16.mxu0 %v825_v5  ;;  %v567_v6 = vpack.c.bf16 %v191_v4, %v190_v3  ;;  %vm568_vm4 = vmpackc.low %vm192_vm3, %vm192_vm3  ;;  %556 = vmatprep.mubr.msk.f32.mxu0 %vm826_vm5, %v827_v7  ;;  %v189_v8 = vld [vmem:[%s154_s30] sm:$0xff]  ;;  %v273_v14 = vlaneseq  ;;  %s537_s16 = sshll.u32 %s808_s12, 3  ;;  %vm282_vm7 = vcmask 130048   ;;  %v289_v30 = vld [vmem:[#allocation5] sm:$0x1]  ;;  %vm297_vm8 = vcmask 122880  }
  0x5f   : > { %570 = vmatprep.subr.bf16.mxu1 %v825_v5  ;;  %563 = vmatprep.mubr.msk.f32.mxu1 %vm826_vm5, %v827_v7  ;;  %v311_v9 = vld [vmem:[#allocation2] sm:$0xff]  ;;  %v312_v10 = vld [vmem:[#allocation2 + $0x8] sm:$0xff]  ;;  %v276_v16 = vstv %s537_s16  ;;  %v301_v40 = vld [vmem:[#allocation4] sm:$0x1]  ;;  %p415_p1 = scmp.eq.s32.totalorder %s808_s12, 1  ;;  %s392_s17 = scalar_lea.vmem [#allocation2], %s537_s16 }
  0x60   : > { %569 = vmatpush3.bf16.xpose.msk.msra.mxu0 %vm568_vm4, %v567_v6  ;;  %654 = vrcp.f32 %v311_v9  ;;  %v274_v15 = vshrl.u32 %v273_v14, 7  ;;  %v279_v18 = vand.u32 127, %v273_v14  ;;  %v393_v44 = vld [vmem:[%s392_s17] sm:$0xff]  ;;  %vm404_vm9 = vcmask 7168   ;;  %v402_v63 = vld [vmem:[#allocation6] sm:$0x1] }
  0x61   : > { %656 = vrcp.f32 %v312_v10  ;;  %vm413_vm10 = vcmask 0   ;;  %v421_v6 = vld [vmem:[#allocation3] sm:$0x1] (%p415_p1) }
  0x62   : > { %v277_v17 = vadd.s32 %v276_v16, %v274_v15 }
  0x64   : > { %vm280_vm6 = vcmp.eq.s32.totalorder %v277_v17, %v279_v18 }
  0x67   : > { %557 = vmatmul.mubr.msk.f32.vlgmr.msra.gmra.mrb[0].mxu0 %vm192_vm3, %v189_v8 }
  0x6a   : > { %v655_v11 = vpop.eup %654 }
  0x6b   : > { %v657_v12 = vpop.eup %656 }
  0x6c   : > { %v571_v13 = vpack.c.bf16 %v657_v12, %v655_v11 }
  0x6e   : > { %572 = vmatpush3.bf16.msra.mxu1 %v571_v13 }
 0x13a   : > { %v268_v19 = vpop.f32.mrb[0].mxu0 }
 0x13b   : > { %v272_v20 = vmul.f32 14.285714, %v268_v19  ;;  %v558_v21 = vpop.f32.mrb[1].mxu0 }
 0x13d   : > { %v281_v22 = vsel %vm280_vm6, %v272_v20, 0.0  ;;  %v299_v23 = vmul.f32 1.442695, %v272_v20 }
 0x13e   : > { %v283_v24 = vsel %vm282_vm7, %v281_v22, 0.0 }
 0x13f   : > { %658 = vpow2.f32 %v299_v23  ;;  %284 = vadd.xlane.f32.xlu0 %v283_v24  ;;  %v290_v25 = vrot.slane %v283_v24, 4 }
 0x140   : > { %660 = vrcp.f32 %v393_v44 }
 0x141   : > { %v291_v26 = vadd.f32 %v290_v25, %v283_v24 }
 0x143   : > { %v292_v27 = vrot.slane %v291_v26, 2 }
 0x145   : > { %v293_v28 = vadd.f32 %v292_v27, %v291_v26 }
 0x147   : > { %v294_v29 = vrot.slane %v293_v28, 1 }
 0x149   : > { %v659_v31 = vpop.eup %658  ;;  %v295_v32 = vadd.f32 %v294_v29, %v293_v28 }
 0x14a   : > { %v302_v33 = vsel %vm282_vm7, %v659_v31, 0.0  ;;  %564 = vmatmul.mubr.msk.f32.vlgmr.msra.gmra.mrb[0].mxu1 %vm282_vm7, %v659_v31  ;;  %v661_v46 = vpop.eup %660 }
 0x14b   : > { %v296_v34 = vadd.f32 %v295_v32, %v289_v30  ;;  %v303_v35 = vrot.slane %v302_v33, 4 }
 0x14d   : > { %298 = vst.msk [vmem:[#allocation5] sm:$0x1] %vm297_vm8, %v296_v34  ;;  %v304_v36 = vadd.f32 %v303_v35, %v302_v33 }
 0x14f   : > { %v305_v37 = vrot.slane %v304_v36, 2 }
 0x151   : > { %v306_v38 = vadd.f32 %v305_v37, %v304_v36 }
 0x153   : > { %v307_v39 = vrot.slane %v306_v38, 1 }
 0x154   : > { %v420_v2 = vld [vmem:[#allocation5] sm:$0x1] (%p415_p1) }
 0x155   : > { %v308_v41 = vadd.f32 %v307_v39, %v306_v38  ;;  %v422_v3 = vmul.f32 (%p415_p1), 0.0, %v420_v2  ;;  %v427_v5 = vmul.f32 (%p415_p1), 1.442695, %v420_v2 }
 0x157   : > { %v309_v42 = vadd.f32 %v308_v41, %v301_v40  ;;  %v423_v4 = vmul.f32 (%p415_p1), 1.442695, %v422_v3 }
 0x159   : > { %310 = vst.msk [vmem:[#allocation4] sm:$0x1] %vm297_vm8, %v309_v42 }
 0x160   : > { %v426_v10 = vld [vmem:[#allocation4] sm:$0x1] (%p415_p1) }
 0x1cc   : > { %v285_v43 = vpop.xlane.xlu0 %284 }
 0x1cd   : > { %v390_v45 = vmul.f32 1.442695, %v285_v43 }
 0x1cf   : > { %662 = vpow2.f32 %v390_v45 }
 0x1d9   : > { %v663_v47 = vpop.eup %662 }
 0x1da   : > { %v396_v48 = vmul.f32 %v663_v47, %v661_v46 }
 0x21d   : > { %v386_v49 = vpop.f32.mrb[0].mxu1 }
 0x21e   : > { %v397_v50 = vsub.f32 %v386_v49, %v396_v48  ;;  %v565_v51 = vpop.f32.mrb[1].mxu1 }
 0x220   : > { %v398_v52 = vmul.f32 15.0, %v397_v50 }
 0x222   : > { %v399_v53 = vadd.f32 %v663_v47, %v398_v52 }
 0x224   : > { %664 = vlog2.f32 %v399_v53 }
 0x225   : > { %666 = vpow2.f32 (%p415_p1), %v423_v4 }
 0x226   : > { %668 = vpow2.f32 (%p415_p1), %v427_v5 }
 0x22e   : > { %v665_v54 = vpop.eup %664 }
 0x22f   : > { %v401_v55 = vmul.f32 0.6931472, %v665_v54  ;;  %v667_v7 = vpop.eup (%p415_p1), %666 }
 0x230   : > { %v425_v8 = vsub.f32 (%p415_p1), %v421_v6, %v667_v7  ;;  %v669_v9 = vpop.eup (%p415_p1), %668 }
 0x231   : > { %v403_v56 = vsub.f32 %v401_v55, %v285_v43  ;;  %v429_v11 = vsub.f32 (%p415_p1), %v426_v10, %v669_v9 }
 0x232   : > { %670 = vrcp.f32 (%p415_p1), %v425_v8 }
 0x233   : > { %v405_v57 = vsel %vm404_vm9, %v403_v56, 0.0  ;;  %v430_v12 = vmul.f32 (%p415_p1), 15.0, %v429_v11 }
 0x234   : > { %v406_v58 = vrot.slane %v405_v57, 4 }
 0x236   : > { %v407_v59 = vadd.f32 %v406_v58, %v405_v57 }
 0x238   : > { %v408_v60 = vrot.slane %v407_v59, 2 }
 0x23a   : > { %v409_v61 = vadd.f32 %v408_v60, %v407_v59 }
 0x23c   : > { %v410_v62 = vrot.slane %v409_v61, 1  ;;  %419 = sbr.rel (!%p415_p1) target bundleno = 740 (0x2e4), region = 48  ;;  %v671_v13 = vpop.eup (%p415_p1), %670 }
 0x23d   : > { %v432_v14 = vmul.f32 (%p415_p1), %v671_v13, %v430_v12 }
 0x23e   : > { %v411_v0 = vadd.f32 %v410_v62, %v409_v61 }
 0x23f   : > { %v433_v15 = vadd.f32 (%p415_p1), %v669_v9, %v432_v14 }
 0x240   : > { %v412_v1 = vadd.f32 %v411_v0, %v402_v63 }
 0x241   : > { %672 = vlog2.f32 (%p415_p1), %v433_v15 }
 0x242   : > { %414 = vst.msk [vmem:[#allocation6] sm:$0x1] %vm413_vm10, %v412_v1 }
 0x249   : > { %v441_v20 = vld [vmem:[#allocation6] sm:$0x1] }
 0x24b   : > { %v673_v16 = vpop.eup %672 }
 0x24c   : > { %v435_v17 = vmul.f32 0.6931472, %v673_v16 }
 0x24e   : > { %v436_v18 = vsub.f32 %v435_v17, %v420_v2 }
 0x250   : > { %v438_v19 = vsel %vm297_vm8, %v436_v18, 0.0 }
 0x251   : > { %439 = vadd.xlane.f32.xlu0 %v438_v19 }
 0x2de   : > { %v440_v21 = vpop.xlane.xlu0 %439 }
 0x2df   : > { %v442_v22 = vadd.f32 %v441_v20, %v440_v21 }
 0x2e1   : > { %v443_v23 = vmul.f32 0.0625, %v442_v22 }
 0x2e3   : > { %445 = vst.msk [vmem:[#allocation12] sm:$0x1] %vm413_vm10, %v443_v23 }
 0x2e4 PF: > { %p1002_p4 = scmp.eq.s32.totalorder %s524_s15, 1  ;;  %s828_s18 = smov [#allocation12]  }
 0x2e5   : > { %s453_s20 = sshll.u32 %s828_s18, 4  ;;  %s454_s20 = int_to_ptr.vmem [resolvable:$true] %s453_s20 }
 0x2e6   : > { %s732_s27 = scalar_lea.vmem %s454_s20, 16  ;;  %s738_s28 = scalar_lea.vmem %s454_s20, 32 }
 0x2e7   : > { %p733_p5 = scmp.ne.s32.totalorder %s454_s20, %s732_s27  ;;  %p739_p10 = scmp.lt.s32.totalorder %s454_s20, %s454_s20 }
 0x2e8   : > { %p740_p11 = scmp.lt.s32.totalorder %s738_s28, %s732_s27 }
 0x2e9   : > { %p734_p8 = pnand %p733_p5, %p1002_p4 }
 0x2ea   : > { %p741_p13 = por %p740_p11, %p739_p10 }
 0x2eb   : > { %p735_p9 = pneg %p734_p8 }
 0x2ed   : > { %p742_p2 = pnand %p741_p13, %p735_p9 }
 0x2ef   : > { %745 = shalt.err (!%p742_p2)
}
 0x2f0   : > { %s746_s3 = scalar_lea.hbm %s1048_s2, 16 }
 0x2f1   : > { %p747_p3 = scmp.ne.s32.totalorder %s1048_s2, %s746_s3  ;;  %p752_p6 = scmp.lt.u32.totalorder %s746_s3, %s1048_s2 }
 0x2f3   : > { %p748_p0 = pnand %p747_p3, %p1002_p4 }
 0x2f5   : > { %p749_p12 = pneg %p748_p0 }
 0x2f7   : > { %p754_p7 = pnand %p752_p6, %p749_p12 }
 0x2f9   : > { %757 = shalt.err (!%p754_p7)
}
 0x2fa   : > { %580 = dma.vmem_to_hbm [thread:$0]  (%p1002_p4), %s454_s20, 16, %s1048_s2, [#allocation9]  }
 0x2fb   : > { %791 = dma.done.wait (%p1002_p4), [#allocation9], 16  }
 0x2fc   : > { %793 = vsyncadd (%p1002_p4), [#allocation9], 4294967280 }
 0x2fd PF: > { %s17_s14 = sadd.s32 1, %s816_s14   ;;  %s1062_s9 = smov %s800_s10 }
 0x2fe   : > { %p14_p1 = scmp.ge.s32.totalorder %s17_s14, 4   ;;  %s1063_s10 = smov %s804_s11 }
 0x2ff   : > { %s1064_s11 = smov %s929_s24  ;;  %s1065_s12 = smov %s812_s13 }
 0x300   : > { %s1066_s13 = smov %s1068_s22  ;;  %16 = sbr.rel (!%p14_p1) target bundleno = 6 (0x6), region = 82 }
 0x307   :  { %466 = vsyncpa [#allocation8], 1 }
 0x308   :  { %468 = vsyncpa [#allocation8 + $0x1], 1 }
 0x309   :  { %469 = vsyncpa [#allocation11], 1 }
 0x30a   :  { %470 = vsyncpa [#allocation9], 1 }
 0x30b   :  { %472 = vsyncpa [#allocation9 + $0x1], 1 }

</bundles_post_ra>
